<compile_context>
chip_gen: v5e
topology: v5e:2x2
jax: 0.10.0
libtpu: 0.0.40
codegen_flags: <defaults>
</compile_context>

<pallas_src>
import functools
import math

import jax
import jax.numpy as jnp
from jax import lax
from jax.experimental import pallas as pl
from jax.experimental.pallas import tpu as pltpu

_VREG_BYTES = 4 * 1024


def _round_up(a: int, b: int) -> int:
    return -(-a // b) * b


def _kmax_kernel(x_ref, o_ref, *, k: int, strip: int, cdt):
    """x_ref: (N, LANE_BLK) tile, pooled axis on sublanes.  o_ref: (k, LANE_BLK)."""
    N = x_ref.shape[0]
    n_strips = x_ref.shape[1] // strip

    # Hoisted out of the strip loop (JAX does not CSE broadcasts / iotas).
    row_idx = lax.broadcasted_iota(jnp.int32, (N, strip), 0)   # (N, strip)
    neg_inf = jnp.array(-jnp.inf, dtype=cdt)

    def strip_body(off):
        x = x_ref[:, pl.ds(off, strip)].astype(cdt)            # (N, strip)

        # ---- Selection: k x (max over sublanes -> first index of max -> mask).
        # Ties break to the lowest index (stable), matching lax.top_k / torch.
        # TODO(synk): NaN inputs repeat the NaN row and genuine -inf inputs are
        # indistinguishable from already-masked rows; fine for CCPM's finite
        # activations.
        masked = x
        idxs, vals = [], []
        for _ in range(k):
            m = jnp.max(masked, axis=0, keepdims=True)          # (1, strip) XLU
            hit = masked == m
            idx = jnp.min(jnp.where(hit, row_idx, N),
                          axis=0, keepdims=True)                # (1, strip) XLU
            idxs.append(idx)
            vals.append(m)
            masked = jnp.where(row_idx == idx, neg_inf, masked)

        # ---- O(k^2) compare-exchange sort of the k (index, value) row pairs
        # so values are emitted in ORIGINAL index order (replaces old Pass 2,
        # which redid full (N, strip) reductions per output row).
        for i in range(k - 1):
            for j in range(k - 1 - i):
                swap = idxs[j] > idxs[j + 1]
                idxs[j], idxs[j + 1] = (jnp.where(swap, idxs[j + 1], idxs[j]),
                                        jnp.where(swap, idxs[j], idxs[j + 1]))
                vals[j], vals[j + 1] = (jnp.where(swap, vals[j + 1], vals[j]),
                                        jnp.where(swap, vals[j], vals[j + 1]))

        out = jnp.concatenate(vals, axis=0) if k > 1 else vals[0]   # (k, strip)
        o_ref[:, pl.ds(off, strip)] = out.astype(o_ref.dtype)

    if n_strips == 1:
        strip_body(0)
    else:
        def loop_body(s, carry):
            strip_body(pl.multiple_of(s * strip, strip))
            return carry
        lax.fori_loop(0, n_strips, loop_body, 0)


def _bf16_native() -> bool:
    """True on chips whose VPU handles bf16 natively (v6e / v7x); False on v5e."""
    try:
        kind = jax.devices()[0].device_kind.lower()
    except Exception:
        return False
    return any(tag in kind for tag in ("v6", "v7", "tpu7"))


def _choose_tiling(N, M, k, in_b, out_b, cdt_b, want_split):
    """Pick (strip, lane_blk): register-resident strip width and DMA tile width."""
    if M <= 128:
        return M, M   # single full-width block, no padding / no ragged edge
    # Strip: keep ~4 live (N, strip) compute-dtype temporaries within ~48 vregs.
    strip = (48 * _VREG_BYTES) // max(1, 4 * N * cdt_b)
    strip = max(128, min(2048, (strip // 128) * 128))
    strip = min(strip, _round_up(M, 128))
    # Lane block: multiple of `strip`; double-buffered I/O stays <= ~8 MiB
    # (safe under v5e's 16 MiB scoped-VMEM default and v7x's 64 MiB VMEM).
    per_lane_io = 2 * (N * in_b + k * out_b)
    cap = max(strip, ((8 << 20) // per_lane_io // strip) * strip)
    cap = min(cap, max(strip, (8192 // strip) * strip))
    needed = _round_up(M, strip)
    lane_blk = min(cap, needed)
    # Prefer >= 2 lane blocks when lanes are the only parallel grid axis so
    # v7x megacore can shard across both TensorCores.
    if want_split and lane_blk >= needed and M > strip:
        lane_blk = _round_up(-(-M // 2), strip)
    return strip, lane_blk


def _mosaic_params(dim_sem, N, k, lane_blk, strip, in_b, out_b, cdt_b):
    # Rough per-step VMEM footprint: double-buffered I/O blocks + per-strip
    # temporaries (which spill for large N).  Only raise the scoped-VMEM limit
    # when v5e's 16 MiB default would be tight; hard-error well before the
    # smallest physical VMEM (v7x: 64 MiB).
    est = (2 * lane_blk * (N * in_b + k * out_b)
           + 6 * N * strip * cdt_b + (1 << 20))
    if est > (48 << 20):
        # TODO(synk): tile the pooled axis (chunked top-k + merge) for very
        # large N; CCPM only uses small pooled dims.
        raise ValueError(
            f"pooled dim too large for single-tile kernel "
            f"(estimated VMEM {est >> 20} MiB)")
    vmem_limit = None if est <= (12 << 20) else int(min(48 << 20, est))
    return pltpu.CompilerParams(dimension_semantics=dim_sem,
                                vmem_limit_bytes=vmem_limit)


def kmax_pooling(x, k: int, dim: int):
    """Pallas implementation of KMaxPooling.forward (top-k in original order)."""
    ndim = x.ndim
    dim = dim % ndim
    N = x.shape[dim]
    if not 1 <= k <= N:
        raise ValueError(f"k={k} must satisfy 1 <= k <= size of pooled dim ({N})")

    pre = math.prod(x.shape[:dim])
    post = math.prod(x.shape[dim + 1:])

    # Compute dtype: bf16 natively on chips with bf16 VPUs, else f32.
    # TODO(synk): integer inputs go through f32; |x| > 2^24 int32 loses precision.
    cdt = jnp.bfloat16 if (x.dtype == jnp.bfloat16 and _bf16_native()) else jnp.float32
    in_b = jnp.dtype(x.dtype).itemsize
    out_b = in_b
    cdt_b = jnp.dtype(cdt).itemsize

    if post >= 128:
        # Copy-free path: reshape only (no HBM transpose); lanes tile `post`,
        # the flattened leading axes become an extra parallel grid dimension.
        x3 = x.reshape(pre, N, post)
        strip, lane_blk = _choose_tiling(N, post, k, in_b, out_b, cdt_b,
                                         want_split=(pre < 2))
        grid = (pre, -(-post // lane_blk))
        out3 = pl.pallas_call(
            functools.partial(_kmax_kernel, k=k, strip=strip, cdt=cdt),
            out_shape=jax.ShapeDtypeStruct((pre, k, post), x.dtype),
            grid=grid,
            in_specs=[pl.BlockSpec((None, N, lane_blk), lambda p, i: (p, 0, i))],
            out_specs=pl.BlockSpec((None, k, lane_blk), lambda p, i: (p, 0, i)),
            compiler_params=_mosaic_params(("parallel", "parallel"),
                                           N, k, lane_blk, strip,
                                           in_b, out_b, cdt_b),
        )(x3)
        return out3.reshape(x.shape[:dim] + (k,) + x.shape[dim + 1:])

    # Small-`post` fallback: move the pooled axis to the front (HBM transpose)
    # so lanes stay dense; only used when post < 128.
    x_moved = jnp.moveaxis(x, dim, 0)
    rest = x_moved.shape[1:]
    M = pre * post
    x2 = x_moved.reshape(N, M)
    strip, lane_blk = _choose_tiling(N, M, k, in_b, out_b, cdt_b, want_split=True)
    grid = (-(-M // lane_blk),)
    out2 = pl.pallas_call(
        functools.partial(_kmax_kernel, k=k, strip=strip, cdt=cdt),
        out_shape=jax.ShapeDtypeStruct((k, M), x.dtype),
        grid=grid,
        in_specs=[pl.BlockSpec((N, lane_blk), lambda i: (0, i))],
        out_specs=pl.BlockSpec((k, lane_blk), lambda i: (0, i)),
        compiler_params=_mosaic_params(("parallel",),
                                       N, k, lane_blk, strip,
                                       in_b, out_b, cdt_b),
    )(x2)
    out = out2.reshape((k,) + rest)
    return jnp.moveaxis(out, 0, dim)


def _reference_kmax(x, k: int, dim: int):
    # Pure-JAX reference: topk indices, sorted, gathered (matches PyTorch).
    xm = jnp.moveaxis(x, dim, -1)
    _, idx = lax.top_k(xm, k)
    idx = jnp.sort(idx, axis=-1)
    out = jnp.take_along_axis(xm, idx, axis=-1)
    return jnp.moveaxis(out, -1, dim)


if __name__ == "__main__":
    # Case 1: CCPM-style NCHW input, pool over dim=2 (small `post` -> 2-D path).
    B, C, H, W = 2, 4, 16, 16
    k1, dim1 = 3, 2
    x1 = jax.random.normal(jax.random.PRNGKey(0), (B, C, H, W), dtype=jnp.float32)
    out1 = jax.block_until_ready(kmax_pooling(x1, k1, dim1))
    ref1 = _reference_kmax(x1, k1, dim1)
    assert out1.shape == (B, C, k1, W), out1.shape
    assert jnp.allclose(out1, ref1, atol=1e-6, rtol=1e-6), "mismatch (case 1)"

    # Case 2: non-multiple-of-8 pooled axis + ragged lane blocks (2 grid steps).
    x2 = jax.random.normal(jax.random.PRNGKey(1), (3, 37, 5, 20), dtype=jnp.float32)
    out2 = jax.block_until_ready(kmax_pooling(x2, 4, 1))
    ref2 = _reference_kmax(x2, 4, 1)
    assert out2.shape == (3, 4, 5, 20), out2.shape
    assert jnp.allclose(out2, ref2, atol=1e-6, rtol=1e-6), "mismatch (case 2)"

    # Case 3: large trailing axis -> copy-free 3-D path (no HBM transpose).
    x3 = jax.random.normal(jax.random.PRNGKey(2), (2, 12, 256), dtype=jnp.float32)
    out3 = jax.block_until_ready(kmax_pooling(x3, 3, 1))
    ref3 = _reference_kmax(x3, 3, 1)
    assert out3.shape == (2, 3, 256), out3.shape
    assert jnp.allclose(out3, ref3, atol=1e-6, rtol=1e-6), "mismatch (case 3)"

    # Case 4: larger pooled dim -> exercises the in-kernel lane-strip loop.
    x4 = jax.random.normal(jax.random.PRNGKey(3), (2, 64, 512), dtype=jnp.float32)
    out4 = jax.block_until_ready(kmax_pooling(x4, 3, 1))
    ref4 = _reference_kmax(x4, 3, 1)
    assert out4.shape == (2, 3, 512), out4.shape
    assert jnp.allclose(out4, ref4, atol=1e-6, rtol=1e-6), "mismatch (case 4)"

    print("KERNEL_OK")
</pallas_src>

<mosaic_0001>
module attributes {stable_mosaic.version = 11 : i64} {
  func.func @_kmax_kernel(%arg0: i32, %arg1: memref<16x128xf32, #tpu.memory_space<vmem>>, %arg2: memref<3x128xf32, #tpu.memory_space<vmem>>) attributes {dimension_semantics = [#tpu.dimension_semantics<parallel>], iteration_bounds = array<i64: 1>, scalar_prefetch = 0 : i64, scratch_operands = 0 : i64, tpu.core_type = #tpu.core_type<tc>, window_params = [{transform_indices = @transform_0, window_bounds = array<i64: 16, 128>}, {transform_indices = @transform_1, window_bounds = array<i64: 3, 128>}]} {
    %0 = tpu.iota {dimensions = array<i32: 0>} : vector<16x128xi32>
    %c0 = arith.constant 0 : index
    %c0_0 = arith.constant 0 : index
    %1 = vector.load %arg1[%c0, %c0_0] : memref<16x128xf32, #tpu.memory_space<vmem>>, vector<16x128xf32>
    %cst = arith.constant dense<0xFF800000> : vector<128xf32>
    %2 = vector.multi_reduction <maximumf>, %1, %cst [0] : vector<16x128xf32> to vector<128xf32>
    %3 = vector.shape_cast %2 : vector<128xf32> to vector<1x128xf32>
    %4 = vector.broadcast %3 : vector<1x128xf32> to vector<16x128xf32>
    %5 = arith.cmpf oeq, %1, %4 : vector<16x128xf32>
    %c16_i32 = arith.constant 16 : i32
    %6 = vector.broadcast %c16_i32 : i32 to vector<16x128xi32>
    %7 = arith.select %5, %0, %6 : vector<16x128xi1>, vector<16x128xi32>
    %cst_1 = arith.constant dense<2147483647> : vector<128xi32>
    %8 = vector.multi_reduction <minsi>, %7, %cst_1 [0] : vector<16x128xi32> to vector<128xi32>
    %9 = vector.shape_cast %8 : vector<128xi32> to vector<1x128xi32>
    %10 = vector.broadcast %9 : vector<1x128xi32> to vector<16x128xi32>
    %11 = arith.cmpi eq, %0, %10 : vector<16x128xi32>
    %cst_2 = arith.constant 0xFF800000 : f32
    %12 = vector.broadcast %cst_2 : f32 to vector<16x128xf32>
    %13 = arith.select %11, %12, %1 : vector<16x128xi1>, vector<16x128xf32>
    %cst_3 = arith.constant dense<0xFF800000> : vector<128xf32>
    %14 = vector.multi_reduction <maximumf>, %13, %cst_3 [0] : vector<16x128xf32> to vector<128xf32>
    %15 = vector.shape_cast %14 : vector<128xf32> to vector<1x128xf32>
    %16 = vector.broadcast %15 : vector<1x128xf32> to vector<16x128xf32>
    %17 = arith.cmpf oeq, %13, %16 : vector<16x128xf32>
    %c16_i32_4 = arith.constant 16 : i32
    %18 = vector.broadcast %c16_i32_4 : i32 to vector<16x128xi32>
    %19 = arith.select %17, %0, %18 : vector<16x128xi1>, vector<16x128xi32>
    %cst_5 = arith.constant dense<2147483647> : vector<128xi32>
    %20 = vector.multi_reduction <minsi>, %19, %cst_5 [0] : vector<16x128xi32> to vector<128xi32>
    %21 = vector.shape_cast %20 : vector<128xi32> to vector<1x128xi32>
    %22 = vector.broadcast %21 : vector<1x128xi32> to vector<16x128xi32>
    %23 = arith.cmpi eq, %0, %22 : vector<16x128xi32>
    %cst_6 = arith.constant 0xFF800000 : f32
    %24 = vector.broadcast %cst_6 : f32 to vector<16x128xf32>
    %25 = arith.select %23, %24, %13 : vector<16x128xi1>, vector<16x128xf32>
    %cst_7 = arith.constant dense<0xFF800000> : vector<128xf32>
    %26 = vector.multi_reduction <maximumf>, %25, %cst_7 [0] : vector<16x128xf32> to vector<128xf32>
    %27 = vector.shape_cast %26 : vector<128xf32> to vector<1x128xf32>
    %28 = vector.broadcast %27 : vector<1x128xf32> to vector<16x128xf32>
    %29 = arith.cmpf oeq, %25, %28 : vector<16x128xf32>
    %c16_i32_8 = arith.constant 16 : i32
    %30 = vector.broadcast %c16_i32_8 : i32 to vector<16x128xi32>
    %31 = arith.select %29, %0, %30 : vector<16x128xi1>, vector<16x128xi32>
    %cst_9 = arith.constant dense<2147483647> : vector<128xi32>
    %32 = vector.multi_reduction <minsi>, %31, %cst_9 [0] : vector<16x128xi32> to vector<128xi32>
    %33 = vector.shape_cast %32 : vector<128xi32> to vector<1x128xi32>
    %34 = arith.cmpi sgt, %9, %21 : vector<1x128xi32>
    %35 = arith.select %34, %21, %9 : vector<1x128xi1>, vector<1x128xi32>
    %36 = arith.select %34, %9, %21 : vector<1x128xi1>, vector<1x128xi32>
    %37 = arith.select %34, %15, %3 : vector<1x128xi1>, vector<1x128xf32>
    %38 = arith.select %34, %3, %15 : vector<1x128xi1>, vector<1x128xf32>
    %39 = arith.cmpi sgt, %36, %33 : vector<1x128xi32>
    %40 = arith.select %39, %33, %36 : vector<1x128xi1>, vector<1x128xi32>
    %41 = arith.select %39, %27, %38 : vector<1x128xi1>, vector<1x128xf32>
    %42 = arith.select %39, %38, %27 : vector<1x128xi1>, vector<1x128xf32>
    %43 = arith.cmpi sgt, %35, %40 : vector<1x128xi32>
    %44 = arith.select %43, %41, %37 : vector<1x128xi1>, vector<1x128xf32>
    %45 = arith.select %43, %37, %41 : vector<1x128xi1>, vector<1x128xf32>
    %46 = tpu.concatenate %44, %45, %42 in 0 : vector<1x128xf32>, vector<1x128xf32>, vector<1x128xf32> -> vector<3x128xf32>
    %c0_10 = arith.constant 0 : index
    %c0_11 = arith.constant 0 : index
    %47 = vector.load %arg2[%c0_10, %c0_11] : memref<3x128xf32, #tpu.memory_space<vmem>>, vector<3x128xf32>
    tpu.vector_store %arg2[%c0_10, %c0_11], %46 {strides = array<i32>} : memref<3x128xf32, #tpu.memory_space<vmem>>, vector<3x128xf32>,
    return
  }
  func.func @transform_0(%arg0: i32) -> (i32, i32) {
    %c0_i32 = arith.constant 0 : i32
    %c0_i32_0 = arith.constant 0 : i32
    return %c0_i32, %arg0 : i32, i32
  }
  func.func @transform_1(%arg0: i32) -> (i32, i32) {
    %c0_i32 = arith.constant 0 : i32
    %c0_i32_0 = arith.constant 0 : i32
    return %c0_i32, %arg0 : i32, i32
  }
}

</mosaic_0001>

<bundles_post_ra>
// kernel: tpu_custom_call.1
= control target key start
LH: loop header
LB: loop body
LE: loop exit
PB: predicated region body
PF: predicated region fallthrough
CT: control target
= control target key end

     0   :  { %6 = vsyncpa [#allocation3], 0  ;;  %s220_s0 = inlined_call_operand.hbm [shape: f32[16,128], index: 0, kind: input, shape index: {}]   ;;  %s221_s1 = inlined_call_operand.hbm [shape: f32[3,128], index: 1, kind: output, shape index: {}]  }
   0x1   :  { %7 = vsyncpa [#allocation4], 0  ;;  %s12_s8 = sshll.u32 %s220_s0, 4  ;;  %s194_s9 = smov [#allocation2]   ;;  %s13_s8 = int_to_ptr.hbm [resolvable:$true] %s12_s8 }
   0x2   :  { %s14_s10 = sshll.u32 %s194_s9, 4  ;;  %s195_s11 = smov 128   ;;  %s15_s10 = int_to_ptr.vmem [resolvable:$true] %s14_s10 }
   0x3   :  { %s196_s12 = smov 8  }
   0x4   :  { %20 = dma.hbm_to_vmem [thread:$0]  %s13_s8, 256, %s15_s10, [#allocation3], %s195_s11, %s195_s11, %s196_s12  }
   0x5   :  { %190 = dma.done.wait [#allocation3], 256  }
   0x6   :  { %191 = vsyncadd [#allocation3], 4294967040  ;;  %v28_v0 = vld [vmem:[#allocation2] sm:$0xff]  ;;  %v29_v1 = vld [vmem:[#allocation2 + $0x8] sm:$0xff]  ;;  %v25_v4 = vlaneseq  ;;  %s197_s0 = smov [#allocation5]   ;;  %s128_s16 = sshll.u32 %s221_s1, 4  ;;  %s129_s16 = int_to_ptr.hbm [resolvable:$true] %s128_s16 }
   0x7   :  { %v30_v2 = vmax.f32 %v28_v0, %v29_v1  ;;  %s126_s13 = sshll.u32 %s197_s0, 4  ;;  %s127_s13 = int_to_ptr.vmem [resolvable:$true] %s126_s13 }
   0x8   :  { %v26_v7 = vshrl.u32 %v25_v4, 7 }
   0x9   :  { %v31_v3 = vrot.slane %v30_v2, 4 }
   0xa   :  { %v27_v10 = vadd.s32 8, %v26_v7 }
   0xb   :  { %v32_v5 = vmax.f32 %v30_v2, %v31_v3 }
   0xd   :  { %v33_v6 = vrot.slane %v32_v5, 2 }
   0xf   :  { %v34_v8 = vmax.f32 %v32_v5, %v33_v6 }
  0x11   :  { %v35_v9 = vrot.slane %v34_v8, 1 }
  0x13   :  { %v211_v11 = vmax.f32 %v34_v8, %v35_v9 }
  0x15   :  { %vm37_vm0 = vcmp.eq.f32.partialorder %v28_v0, %v211_v11  ;;  %vm38_vm1 = vcmp.eq.f32.partialorder %v29_v1, %v211_v11 }
  0x16   :  { %v39_v12 = vsel %vm37_vm0, %v26_v7, 16  ;;  %v40_v13 = vsel %vm38_vm1, %v27_v10, 16 }
  0x17   :  { %vm41_vm2 = vcmp.lt.s32.totalorder %v39_v12, %v40_v13 }
  0x18   :  { %v42_v14 = vsel %vm41_vm2, %v39_v12, %v40_v13 }
  0x19   :  { %v43_v15 = vrot.slane %v42_v14, 4 }
  0x1b   :  { %vm44_vm3 = vcmp.lt.s32.totalorder %v42_v14, %v43_v15 }
  0x1c   :  { %v45_v16 = vsel %vm44_vm3, %v42_v14, %v43_v15 }
  0x1d   :  { %v46_v17 = vrot.slane %v45_v16, 2 }
  0x1f   :  { %vm47_vm4 = vcmp.lt.s32.totalorder %v45_v16, %v46_v17 }
  0x20   :  { %v48_v18 = vsel %vm47_vm4, %v45_v16, %v46_v17 }
  0x21   :  { %v49_v19 = vrot.slane %v48_v18, 1 }
  0x23   :  { %vm50_vm5 = vcmp.lt.s32.totalorder %v48_v18, %v49_v19 }
  0x24   :  { %v51_v20 = vsel %vm50_vm5, %v48_v18, %v49_v19 }
  0x25   :  { %vm52_vm6 = vcmp.eq.s32.totalorder %v26_v7, %v51_v20  ;;  %vm53_vm7 = vcmp.eq.s32.totalorder %v27_v10, %v51_v20 }
  0x26   :  { %v54_v21 = vsel %vm52_vm6, -inf, %v28_v0  ;;  %v55_v22 = vsel %vm53_vm7, -inf, %v29_v1 }
  0x27   :  { %v56_v23 = vmax.f32 %v54_v21, %v55_v22 }
  0x29   :  { %v57_v24 = vrot.slane %v56_v23, 4 }
  0x2b   :  { %v58_v25 = vmax.f32 %v56_v23, %v57_v24 }
  0x2d   :  { %v59_v26 = vrot.slane %v58_v25, 2 }
  0x2f   :  { %v60_v27 = vmax.f32 %v58_v25, %v59_v26 }
  0x31   :  { %v61_v28 = vrot.slane %v60_v27, 1 }
  0x33   :  { %v62_v29 = vmax.f32 %v60_v27, %v61_v28 }
  0x35   :  { %vm63_vm8 = vcmp.eq.f32.partialorder %v54_v21, %v62_v29  ;;  %vm64_vm9 = vcmp.eq.f32.partialorder %v55_v22, %v62_v29 }
  0x36   :  { %v65_v30 = vsel %vm63_vm8, %v26_v7, 16  ;;  %v66_v31 = vsel %vm64_vm9, %v27_v10, 16  ;;  %vm116_vm8 = vcmask 1040384  }
  0x37   :  { %vm67_vm10 = vcmp.lt.s32.totalorder %v65_v30, %v66_v31 }
  0x38   :  { %v68_v32 = vsel %vm67_vm10, %v65_v30, %v66_v31  ;;  %vm118_vm10 = vcmask 1041408  }
  0x39   :  { %v69_v33 = vrot.slane %v68_v32, 4 }
  0x3b   :  { %vm70_vm11 = vcmp.lt.s32.totalorder %v68_v32, %v69_v33 }
  0x3c   :  { %v71_v34 = vsel %vm70_vm11, %v68_v32, %v69_v33 }
  0x3d   :  { %v72_v35 = vrot.slane %v71_v34, 2 }
  0x3f   :  { %vm73_vm12 = vcmp.lt.s32.totalorder %v71_v34, %v72_v35 }
  0x40   :  { %v74_v36 = vsel %vm73_vm12, %v71_v34, %v72_v35 }
  0x41   :  { %v75_v37 = vrot.slane %v74_v36, 1 }
  0x43   :  { %vm76_vm13 = vcmp.lt.s32.totalorder %v74_v36, %v75_v37 }
  0x44   :  { %v77_v38 = vsel %vm76_vm13, %v74_v36, %v75_v37 }
  0x45   :  { %vm78_vm14 = vcmp.eq.s32.totalorder %v26_v7, %v77_v38  ;;  %vm79_vm15 = vcmp.eq.s32.totalorder %v27_v10, %v77_v38  ;;  %vm104_vm5 = vcmp.gt.s32.totalorder %v51_v20, %v77_v38 }
  0x46   :  { %v80_v39 = vsel %vm78_vm14, -inf, %v54_v21  ;;  %v81_v40 = vsel %vm79_vm15, -inf, %v55_v22  ;;  %v106_v56 = vsel %vm104_vm5, %v51_v20, %v77_v38  ;;  %v108_v57 = vsel %vm104_vm5, %v211_v11, %v62_v29 }
  0x47   :  { %v82_v41 = vmax.f32 %v80_v39, %v81_v40  ;;  %v105_v59 = vsel %vm104_vm5, %v77_v38, %v51_v20  ;;  %v107_v60 = vsel %vm104_vm5, %v62_v29, %v211_v11 }
  0x49   :  { %v83_v42 = vrot.slane %v82_v41, 4 }
  0x4b   :  { %v84_v43 = vmax.f32 %v82_v41, %v83_v42 }
  0x4d   :  { %v85_v44 = vrot.slane %v84_v43, 2 }
  0x4f   :  { %v86_v45 = vmax.f32 %v84_v43, %v85_v44 }
  0x51   :  { %v87_v46 = vrot.slane %v86_v45, 1 }
  0x53   :  { %v88_v47 = vmax.f32 %v86_v45, %v87_v46 }
  0x55   :  { %vm89_vm0 = vcmp.eq.f32.partialorder %v80_v39, %v88_v47  ;;  %vm90_vm1 = vcmp.eq.f32.partialorder %v81_v40, %v88_v47 }
  0x56   :  { %v91_v48 = vsel %vm89_vm0, %v26_v7, 16  ;;  %v92_v49 = vsel %vm90_vm1, %v27_v10, 16 }
  0x57   :  { %vm93_vm2 = vcmp.lt.s32.totalorder %v91_v48, %v92_v49 }
  0x58   :  { %v94_v50 = vsel %vm93_vm2, %v91_v48, %v92_v49 }
  0x59   :  { %v95_v51 = vrot.slane %v94_v50, 4 }
  0x5b   :  { %vm96_vm3 = vcmp.lt.s32.totalorder %v94_v50, %v95_v51 }
  0x5c   :  { %v97_v52 = vsel %vm96_vm3, %v94_v50, %v95_v51 }
  0x5d   :  { %v98_v53 = vrot.slane %v97_v52, 2 }
  0x5f   :  { %vm99_vm4 = vcmp.lt.s32.totalorder %v97_v52, %v98_v53 }
  0x60   :  { %v100_v54 = vsel %vm99_vm4, %v97_v52, %v98_v53 }
  0x61   :  { %v101_v55 = vrot.slane %v100_v54, 1 }
  0x63   :  { %vm102_vm6 = vcmp.lt.s32.totalorder %v100_v54, %v101_v55 }
  0x64   :  { %v103_v58 = vsel %vm102_vm6, %v100_v54, %v101_v55 }
  0x65   :  { %vm109_vm7 = vcmp.gt.s32.totalorder %v106_v56, %v103_v58 }
  0x66   :  { %v110_v61 = vsel %vm109_vm7, %v103_v58, %v106_v56  ;;  %v111_v62 = vsel %vm109_vm7, %v88_v47, %v108_v57  ;;  %v112_v63 = vsel %vm109_vm7, %v108_v57, %v88_v47 }
  0x67   :  { %vm113_vm9 = vcmp.gt.s32.totalorder %v105_v59, %v110_v61 }
  0x68   :  { %v114_v0 = vsel %vm113_vm9, %v111_v62, %v107_v60  ;;  %v115_v1 = vsel %vm113_vm9, %v107_v60, %v111_v62 }
  0x69   :  { %v117_v2 = vsel %vm116_vm8, %v114_v0, %v115_v1 }
  0x6a   :  { %v119_v3 = vsel %vm118_vm10, %v117_v2, %v112_v63 }
  0x6b   :  { %120 = vst [vmem:[#allocation5] sm:$0x7] %v119_v3 }
  0x6c   :  { %131 = dma.vmem_to_hbm [thread:$0]  %s127_s13, 64, %s129_s16, [#allocation4]  }
  0x6d   :  { %192 = dma.done.wait [#allocation4], 64  }
  0x6e   :  { %193 = vsyncadd [#allocation4], 4294967232 }
  0x6f   :  { %136 = vsyncpa [#allocation3], 1 }
  0x70   :  { %137 = vsyncpa [#allocation4], 1 }

</bundles_post_ra>
